<compile_context>
chip_gen: v5e
topology: v5e:2x2
jax: 0.10.0
libtpu: 0.0.40
codegen_flags: <defaults>
</compile_context>

<pallas_src>
import functools

import jax
import jax.numpy as jnp
from jax.experimental import pallas as pl
from jax.experimental.pallas import tpu as pltpu


def _round_up(x, m):
    return ((x + m - 1) // m) * m


def _choose_tile(batch, b_tile):
    """Batch tile: multiple of 128 (lane-dense output) and, when the batch is
    large enough, sized so the grid has >= 2 steps (v7x megacore sharding)."""
    b_tile = max(128, _round_up(b_tile, 128))
    bt = min(b_tile, _round_up(max(pl.cdiv(batch, 2), 1), 128))
    bp = _round_up(batch, bt)
    return bt, bp


def _rank_towers_kernel(q_ref, *rest, n_docs):
    """Two-tower ranking scores for one batch tile.

    q_ref           : [Bt, Dq]  f32 query features (streamed)
    rest[:n_docs]   : [Bt, Dd]  f32 doc features, one per document (streamed)
    rest[n_docs:]   : wq [Dq,H] bf16, bq [1,H] f32, wd [Dd,H] bf16, bd [1,H] f32
                      (grid-invariant, resident), o_ref [n_docs, Bt] f32 out.
    """
    d_refs = rest[:n_docs]
    wq_ref, bq_ref, wd_ref, bd_ref, o_ref = rest[n_docs:]

    wq = wq_ref[...]                                    # bf16, resident
    wd = wd_ref[...]

    # Query tower: one MXU pass, f32 accumulation; bias+ReLU in f32 (VPU).
    hq = jnp.maximum(
        jnp.dot(q_ref[...].astype(jnp.bfloat16), wq,
                preferred_element_type=jnp.float32) + bq_ref[...],
        0.0,
    )

    for t in range(n_docs):
        hd = jnp.maximum(
            jnp.dot(d_refs[t][...].astype(jnp.bfloat16), wd,
                    preferred_element_type=jnp.float32) + bd_ref[...],
            0.0,
        )
        # Dot-product scorer.  Transpose the [Bt, H] product (full (8,128)-tile
        # XLU transpose: Bt and H are multiples of 128) and reduce over the
        # sublane axis -> a lane-dense [1, Bt] row -> unmasked stores.
        prod_t = (hq * hd).T                            # [H, Bt]
        o_ref[pl.ds(t, 1), :] = jnp.sum(prod_t, axis=0, keepdims=True)


def _rank_scores(q, docs, wq, bq, wd, bd, *, b_tile):
    """Batch-tiled pallas_call: separate row-blocked feature inputs, resident
    per-tower weights, single lane-dense (n_docs, B_padded) output."""
    B, Dq = q.shape
    Dd = docs[0].shape[1]
    H = wq.shape[1]
    assert H % 128 == 0, "hidden dim must be a multiple of 128"
    n_docs = len(docs)

    bt, bp = _choose_tile(B, b_tile)
    if bp != B:
        pad = ((0, bp - B), (0, 0))
        q = jnp.pad(q, pad)
        docs = [jnp.pad(d, pad) for d in docs]

    # Static parameters: bf16 weights for the MXU, f32 biases for the VPU.
    # (Per-call cast is tiny; hoist/precompute once in a real serving path.)
    wq_b = wq.astype(jnp.bfloat16)
    wd_b = wd.astype(jnp.bfloat16)
    bq_f = bq.reshape(1, H).astype(jnp.float32)
    bd_f = bd.reshape(1, H).astype(jnp.float32)

    grid = (bp // bt,)
    kernel = functools.partial(_rank_towers_kernel, n_docs=n_docs)

    def row_spec(cols):
        return pl.BlockSpec((bt, cols), lambda i: (i, 0))

    def invariant_spec(shape):
        return pl.BlockSpec(shape, lambda i: (0, 0))

    out = pl.pallas_call(
        kernel,
        out_shape=jax.ShapeDtypeStruct((n_docs, bp), jnp.float32),
        grid=grid,
        in_specs=(
            [row_spec(Dq)]                      # q: streamed, double-buffered
            + [row_spec(Dd)] * n_docs           # docs: streamed
            + [invariant_spec(wq_b.shape),      # weights/biases: resident
               invariant_spec(bq_f.shape),
               invariant_spec(wd_b.shape),
               invariant_spec(bd_f.shape)]
        ),
        out_specs=pl.BlockSpec((n_docs, bt), lambda i: (0, i)),
        compiler_params=pltpu.CompilerParams(
            # Batch tiles are independent -> megacore sharding on v7x
            # (no-op on single-TC v5e/v6e).
            dimension_semantics=("parallel",),
        ),
    )(q, *docs, wq_b, bq_f, wd_b, bd_f)

    return out[:, :B]


def normal_rank_nn_forward(q, d, wq, bq, wd, bd, b_tile=2048):
    """Module contract: model.forward(q, d) -> per-pair score [B]."""
    scores = _rank_scores(q, [d], wq, bq, wd, bd, b_tile=b_tile)
    return scores[0]


def normal_rank_nn_pair_forward(q, d_pos, d_neg, wq, bq, wd, bd, b_tile=2048):
    """Fused pos/neg scoring (MarginRankingLoss path): one launch, shared
    resident weights and shared query-tower activation."""
    scores = _rank_scores(q, [d_pos, d_neg], wq, bq, wd, bd, b_tile=b_tile)
    return scores[0], scores[1]


def reference_forward(q, d, wq, bq, wd, bd):
    """Pure-JAX f32 reference for correctness checking."""
    hq = jnp.maximum(q.astype(jnp.float32) @ wq.astype(jnp.float32) + bq, 0.0)
    hd = jnp.maximum(d.astype(jnp.float32) @ wd.astype(jnp.float32) + bd, 0.0)
    return jnp.sum(hq * hd, axis=-1)


if __name__ == "__main__":
    # Small shapes consistent with the ranking-model contract.
    B, Dq, Dd, H = 8, 32, 32, 128

    key = jax.random.PRNGKey(0)
    kq, kp, kn, kwq, kbq, kwd, kbd = jax.random.split(key, 7)

    q = jax.random.normal(kq, (B, Dq), dtype=jnp.float32)
    d_pos = jax.random.normal(kp, (B, Dd), dtype=jnp.float32)
    d_neg = jax.random.normal(kn, (B, Dd), dtype=jnp.float32)

    wq = jax.random.normal(kwq, (Dq, H), dtype=jnp.float32) / jnp.sqrt(Dq)
    bq = jax.random.normal(kbq, (1, H), dtype=jnp.float32) * 0.01
    wd = jax.random.normal(kwd, (Dd, H), dtype=jnp.float32) / jnp.sqrt(Dd)
    bd = jax.random.normal(kbd, (1, H), dtype=jnp.float32) * 0.01

    # Single-doc forward (module contract).
    s = normal_rank_nn_forward(q, d_pos, wq, bq, wd, bd)
    s = jax.block_until_ready(s)

    # Fused pos/neg forward (training path).
    sp, sn = normal_rank_nn_pair_forward(q, d_pos, d_neg, wq, bq, wd, bd)
    sp, sn = jax.block_until_ready((sp, sn))

    ref_p = reference_forward(q, d_pos, wq, bq, wd, bd)
    ref_n = reference_forward(q, d_neg, wq, bq, wd, bd)

    # bf16 matmul inputs -> loose-ish tolerance against the f32 reference.
    assert s.shape == (B,)
    assert sp.shape == (B,) and sn.shape == (B,)
    assert jnp.allclose(s, ref_p, atol=2e-1, rtol=3e-2), (s, ref_p)
    assert jnp.allclose(sp, ref_p, atol=2e-1, rtol=3e-2), (sp, ref_p)
    assert jnp.allclose(sn, ref_n, atol=2e-1, rtol=3e-2), (sn, ref_n)

    print("KERNEL_OK")
</pallas_src>

<mosaic_0001>
module attributes {stable_mosaic.version = 11 : i64} {
  func.func @_rank_towers_kernel(%arg0: i32, %arg1: memref<128x32xf32, #tpu.memory_space<vmem>>, %arg2: memref<128x32xf32, #tpu.memory_space<vmem>>, %arg3: memref<32x128xbf16, #tpu.memory_space<vmem>>, %arg4: memref<1x128xf32, #tpu.memory_space<vmem>>, %arg5: memref<32x128xbf16, #tpu.memory_space<vmem>>, %arg6: memref<1x128xf32, #tpu.memory_space<vmem>>, %arg7: memref<1x128xf32, #tpu.memory_space<vmem>>) attributes {dimension_semantics = [#tpu.dimension_semantics<parallel>], iteration_bounds = array<i64: 1>, scalar_prefetch = 0 : i64, scratch_operands = 0 : i64, tpu.core_type = #tpu.core_type<tc>, window_params = [{transform_indices = @transform_0, window_bounds = array<i64: 128, 32>}, {transform_indices = @transform_1, window_bounds = array<i64: 128, 32>}, {pipeline_mode = #tpu.pipeline_mode<synchronous>, transform_indices = @transform_2, window_bounds = array<i64: 32, 128>}, {pipeline_mode = #tpu.pipeline_mode<synchronous>, transform_indices = @transform_3, window_bounds = array<i64: 1, 128>}, {pipeline_mode = #tpu.pipeline_mode<synchronous>, transform_indices = @transform_4, window_bounds = array<i64: 32, 128>}, {pipeline_mode = #tpu.pipeline_mode<synchronous>, transform_indices = @transform_5, window_bounds = array<i64: 1, 128>}, {transform_indices = @transform_6, window_bounds = array<i64: 1, 128>}]} {
    %c0 = arith.constant 0 : index
    %c0_0 = arith.constant 0 : index
    %0 = vector.load %arg3[%c0, %c0_0] : memref<32x128xbf16, #tpu.memory_space<vmem>>, vector<32x128xbf16>
    %c0_1 = arith.constant 0 : index
    %c0_2 = arith.constant 0 : index
    %1 = vector.load %arg5[%c0_1, %c0_2] : memref<32x128xbf16, #tpu.memory_space<vmem>>, vector<32x128xbf16>
    %c0_3 = arith.constant 0 : index
    %c0_4 = arith.constant 0 : index
    %2 = vector.load %arg1[%c0_3, %c0_4] : memref<128x32xf32, #tpu.memory_space<vmem>>, vector<128x32xf32>
    %3 = arith.truncf %2 : vector<128x32xf32> to vector<128x32xbf16>
    %cst = arith.constant dense<0.000000e+00> : vector<128x128xf32>
    %4 = tpu.matmul %3, %0, %cst {dimension_numbers = #tpu.dot_dimension_numbers<[1], [0], [0], [1], [0, 0, 1, 1], [], []>} : vector<128x32xbf16>, vector<32x128xbf16>, vector<128x128xf32> -> vector<128x128xf32>
    %c0_5 = arith.constant 0 : index
    %c0_6 = arith.constant 0 : index
    %5 = vector.load %arg4[%c0_5, %c0_6] : memref<1x128xf32, #tpu.memory_space<vmem>>, vector<1x128xf32>
    %6 = vector.broadcast %5 : vector<1x128xf32> to vector<128x128xf32>
    %7 = arith.addf %4, %6 : vector<128x128xf32>
    %cst_7 = arith.constant 0.000000e+00 : f32
    %8 = vector.broadcast %cst_7 : f32 to vector<128x128xf32>
    %9 = arith.maximumf %7, %8 : vector<128x128xf32>
    %c0_8 = arith.constant 0 : index
    %c0_9 = arith.constant 0 : index
    %10 = vector.load %arg2[%c0_8, %c0_9] : memref<128x32xf32, #tpu.memory_space<vmem>>, vector<128x32xf32>
    %11 = arith.truncf %10 : vector<128x32xf32> to vector<128x32xbf16>
    %cst_10 = arith.constant dense<0.000000e+00> : vector<128x128xf32>
    %12 = tpu.matmul %11, %1, %cst_10 {dimension_numbers = #tpu.dot_dimension_numbers<[1], [0], [0], [1], [0, 0, 1, 1], [], []>} : vector<128x32xbf16>, vector<32x128xbf16>, vector<128x128xf32> -> vector<128x128xf32>
    %c0_11 = arith.constant 0 : index
    %c0_12 = arith.constant 0 : index
    %13 = vector.load %arg6[%c0_11, %c0_12] : memref<1x128xf32, #tpu.memory_space<vmem>>, vector<1x128xf32>
    %14 = vector.broadcast %13 : vector<1x128xf32> to vector<128x128xf32>
    %15 = arith.addf %12, %14 : vector<128x128xf32>
    %cst_13 = arith.constant 0.000000e+00 : f32
    %16 = vector.broadcast %cst_13 : f32 to vector<128x128xf32>
    %17 = arith.maximumf %15, %16 : vector<128x128xf32>
    %18 = arith.mulf %9, %17 : vector<128x128xf32>
    %19 = tpu.transpose %18, [1, 0] : vector<128x128xf32> -> vector<128x128xf32>
    %cst_14 = arith.constant dense<0.000000e+00> : vector<128xf32>
    %20 = vector.multi_reduction <add>, %19, %cst_14 [0] : vector<128x128xf32> to vector<128xf32>
    %21 = vector.shape_cast %20 : vector<128xf32> to vector<1x128xf32>
    %c0_15 = arith.constant 0 : index
    %c0_16 = arith.constant 0 : index
    %22 = vector.load %arg7[%c0_15, %c0_16] : memref<1x128xf32, #tpu.memory_space<vmem>>, vector<1x128xf32>
    tpu.vector_store %arg7[%c0_15, %c0_16], %21 {strides = array<i32>} : memref<1x128xf32, #tpu.memory_space<vmem>>, vector<1x128xf32>,
    return
  }
  func.func @transform_0(%arg0: i32) -> (i32, i32) {
    %c0_i32 = arith.constant 0 : i32
    %c0_i32_0 = arith.constant 0 : i32
    return %arg0, %c0_i32 : i32, i32
  }
  func.func @transform_1(%arg0: i32) -> (i32, i32) {
    %c0_i32 = arith.constant 0 : i32
    %c0_i32_0 = arith.constant 0 : i32
    return %arg0, %c0_i32 : i32, i32
  }
  func.func @transform_2(%arg0: i32) -> (i32, i32) {
    %c0_i32 = arith.constant 0 : i32
    %c0_i32_0 = arith.constant 0 : i32
    %c0_i32_1 = arith.constant 0 : i32
    return %c0_i32, %c0_i32_0 : i32, i32
  }
  func.func @transform_3(%arg0: i32) -> (i32, i32) {
    %c0_i32 = arith.constant 0 : i32
    %c0_i32_0 = arith.constant 0 : i32
    %c0_i32_1 = arith.constant 0 : i32
    return %c0_i32, %c0_i32_0 : i32, i32
  }
  func.func @transform_4(%arg0: i32) -> (i32, i32) {
    %c0_i32 = arith.constant 0 : i32
    %c0_i32_0 = arith.constant 0 : i32
    %c0_i32_1 = arith.constant 0 : i32
    return %c0_i32, %c0_i32_0 : i32, i32
  }
  func.func @transform_5(%arg0: i32) -> (i32, i32) {
    %c0_i32 = arith.constant 0 : i32
    %c0_i32_0 = arith.constant 0 : i32
    %c0_i32_1 = arith.constant 0 : i32
    return %c0_i32, %c0_i32_0 : i32, i32
  }
  func.func @transform_6(%arg0: i32) -> (i32, i32) {
    %c0_i32 = arith.constant 0 : i32
    %c0_i32_0 = arith.constant 0 : i32
    return %c0_i32, %arg0 : i32, i32
  }
}

</mosaic_0001>

<bundles_post_ra>
// kernel: tpu_custom_call.1
= control target key start
LH: loop header
LB: loop body
LE: loop exit
PB: predicated region body
PF: predicated region fallthrough
CT: control target
= control target key end

     0   :  { %s652_s0 = inlined_call_operand.vmem [shape: f32[128,32], index: 0, kind: input, shape index: {}]   ;;  %s653_s1 = inlined_call_operand.vmem [shape: f32[128,32], index: 1, kind: input, shape index: {}]   ;;  %s654_s2 = inlined_call_operand.vmem [shape: bf16[32,128], index: 2, kind: input, shape index: {}]   ;;  %s655_s3 = inlined_call_operand.vmem [shape: f32[1,128], index: 3, kind: input, shape index: {}]   ;;  %s656_s4 = inlined_call_operand.vmem [shape: bf16[32,128], index: 4, kind: input, shape index: {}]   ;;  %s657_s5 = inlined_call_operand.vmem [shape: f32[1,128], index: 5, kind: input, shape index: {}]   ;;  %s658_s6 = inlined_call_operand.hbm [shape: f32[1,128], index: 6, kind: output, shape index: {}]  }
   0x1   :  { %v411_v0 = vld [vmem:[%s654_s2 + $0x8] sm:$0xff]  ;;  %v410_v2 = vld [vmem:[%s654_s2] sm:$0xff] }
   0x2   :  { %v413_v1 = vld [vmem:[%s656_s4 + $0x8] sm:$0xff]  ;;  %v412_v3 = vld [vmem:[%s656_s4] sm:$0xff]  ;;  %104 = vmatpush.bf16.msra.mxu0 %v411_v0  ;;  %414 = vmatpush.bf16.msra.mxu2 %v411_v0 }
   0x3   :  { %v33_v4 = vld [vmem:[%s652_s0] sm:$0xff]  ;;  %233 = vmatpush.bf16.msra.mxu1 %v413_v1  ;;  %v34_v5 = vld [vmem:[%s652_s0 + $0x8] sm:$0xff]  ;;  %416 = vmatpush.bf16.msra.mxu3 %v413_v1 }
   0x4   :  { %v163_v6 = vld [vmem:[%s653_s1] sm:$0xff]  ;;  %v164_v7 = vld [vmem:[%s653_s1 + $0x8] sm:$0xff]  ;;  %v49_v8 = vpack.c.bf16 %v34_v5, %v33_v4 }
   0x5   :  { %v179_v9 = vpack.c.bf16 %v164_v7, %v163_v6 }
   0x6   :  { %11 = vsyncpa [#allocation3], 0  ;;  %105 = vmatpush.bf16.msra.mxu0 %v410_v2  ;;  %vm73_vm0 = vcmask 261120   ;;  %415 = vmatpush.bf16.msra.mxu2 %v410_v2  ;;  %v35_v10 = vld [vmem:[%s652_s0 + $0x10] sm:$0xff]  ;;  %v36_v11 = vld [vmem:[%s652_s0 + $0x18] sm:$0xff]  ;;  %s369_s19 = sshll.u32 %s658_s6, 4  ;;  %s370_s19 = int_to_ptr.hbm [resolvable:$true] %s369_s19 }
   0x7   :  { %234 = vmatpush.bf16.msra.mxu1 %v412_v3  ;;  %417 = vmatpush.bf16.msra.mxu3 %v412_v3  ;;  %v165_v12 = vld [vmem:[%s653_s1 + $0x10] sm:$0xff]  ;;  %v166_v13 = vld [vmem:[%s653_s1 + $0x18] sm:$0xff]  ;;  %v50_v14 = vpack.c.bf16 %v36_v11, %v35_v10  ;;  %v41_v16 = vld [vmem:[%s652_s0 + $0x40] sm:$0xff] }
   0x8   :  { %v180_v15 = vpack.c.bf16 %v166_v13, %v165_v12  ;;  %v42_v17 = vld [vmem:[%s652_s0 + $0x48] sm:$0xff]  ;;  %v171_v18 = vld [vmem:[%s653_s1 + $0x40] sm:$0xff]  ;;  %v43_v26 = vld [vmem:[%s652_s0 + $0x50] sm:$0xff] }
   0x9   :  { %386 = vmatmul.msk.bf16.vlgmr.msra.gmra.mxu0 %vm73_vm0, %v49_v8  ;;  %v53_v19 = vpack.c.bf16 %v42_v17, %v41_v16  ;;  %v172_v20 = vld [vmem:[%s653_s1 + $0x48] sm:$0xff]  ;;  %v37_v22 = vld [vmem:[%s652_s0 + $0x20] sm:$0xff]  ;;  %v44_v27 = vld [vmem:[%s652_s0 + $0x58] sm:$0xff] }
   0xa   :  { %402 = vmatmul.msk.bf16.vlgmr.msra.gmra.mxu1 %vm73_vm0, %v179_v9  ;;  %v183_v21 = vpack.c.bf16 %v172_v20, %v171_v18  ;;  %v38_v23 = vld [vmem:[%s652_s0 + $0x28] sm:$0xff]  ;;  %v167_v24 = vld [vmem:[%s653_s1 + $0x20] sm:$0xff]  ;;  %v173_v30 = vld [vmem:[%s653_s1 + $0x50] sm:$0xff]  ;;  %v54_v32 = vpack.c.bf16 %v44_v27, %v43_v26 }
   0xb   :  { %390 = vmatmul.msk.bf16.vlgmr.msra.gmra.mxu2 %vm73_vm0, %v53_v19  ;;  %v168_v25 = vld [vmem:[%s653_s1 + $0x28] sm:$0xff]  ;;  %v51_v28 = vpack.c.bf16 %v38_v23, %v37_v22  ;;  %v174_v31 = vld [vmem:[%s653_s1 + $0x58] sm:$0xff]  ;;  %v39_v34 = vld [vmem:[%s652_s0 + $0x30] sm:$0xff] }
   0xc   :  { %406 = vmatmul.msk.bf16.vlgmr.msra.gmra.mxu3 %vm73_vm0, %v183_v21  ;;  %v181_v29 = vpack.c.bf16 %v168_v25, %v167_v24  ;;  %v184_v33 = vpack.c.bf16 %v174_v31, %v173_v30  ;;  %v40_v35 = vld [vmem:[%s652_s0 + $0x38] sm:$0xff]  ;;  %v169_v36 = vld [vmem:[%s653_s1 + $0x30] sm:$0xff]  ;;  %v45_v38 = vld [vmem:[%s652_s0 + $0x60] sm:$0xff] }
   0xd   :  { %v170_v37 = vld [vmem:[%s653_s1 + $0x38] sm:$0xff]  ;;  %v46_v39 = vld [vmem:[%s652_s0 + $0x68] sm:$0xff]  ;;  %v52_v40 = vpack.c.bf16 %v40_v35, %v39_v34  ;;  %v175_v42 = vld [vmem:[%s653_s1 + $0x60] sm:$0xff] }
   0xe   :  { %v182_v41 = vpack.c.bf16 %v170_v37, %v169_v36  ;;  %v176_v43 = vld [vmem:[%s653_s1 + $0x68] sm:$0xff]  ;;  %v55_v44 = vpack.c.bf16 %v46_v39, %v45_v38  ;;  %v47_v46 = vld [vmem:[%s652_s0 + $0x70] sm:$0xff]  ;;  %v48_v47 = vld [vmem:[%s652_s0 + $0x78] sm:$0xff] }
   0xf   :  { %v185_v45 = vpack.c.bf16 %v176_v43, %v175_v42  ;;  %v177_v48 = vld [vmem:[%s653_s1 + $0x70] sm:$0xff]  ;;  %v178_v49 = vld [vmem:[%s653_s1 + $0x78] sm:$0xff]  ;;  %v56_v50 = vpack.c.bf16 %v48_v47, %v47_v46  ;;  %v610_v52 = vld [vmem:[%s655_s3] ss:$0 sm:$0xff]  ;;  %s447_s1 = smov [#allocation2]  }
  0x10   :  { %v186_v51 = vpack.c.bf16 %v178_v49, %v177_v48  ;;  %v615_v53 = vld [vmem:[%s657_s5] ss:$0 sm:$0xff]  ;;  %s367_s3 = sshll.u32 %s447_s1, 4  ;;  %s368_s3 = int_to_ptr.vmem [resolvable:$true] %s367_s3 }
  0x19   :  { %387 = vmatmul.msk.bf16.gmra.mxu0 %vm73_vm0, %v50_v14 }
  0x1a   :  { %403 = vmatmul.msk.bf16.gmra.mxu1 %vm73_vm0, %v180_v15 }
  0x1b   :  { %391 = vmatmul.msk.bf16.gmra.mxu2 %vm73_vm0, %v54_v32 }
  0x1c   :  { %407 = vmatmul.msk.bf16.gmra.mxu3 %vm73_vm0, %v184_v33 }
  0x29   :  { %388 = vmatmul.msk.bf16.gmra.mxu0 %vm73_vm0, %v51_v28 }
  0x2a   :  { %404 = vmatmul.msk.bf16.gmra.mxu1 %vm73_vm0, %v181_v29 }
  0x2b   :  { %392 = vmatmul.msk.bf16.gmra.mxu2 %vm73_vm0, %v55_v44 }
  0x2c   :  { %408 = vmatmul.msk.bf16.gmra.mxu3 %vm73_vm0, %v185_v45 }
  0x39   :  { %389 = vmatmul.msk.bf16.gmra.mxu0 %vm73_vm0, %v52_v40 }
  0x3a   :  { %405 = vmatmul.msk.bf16.gmra.mxu1 %vm73_vm0, %v182_v41 }
  0x3b   :  { %393 = vmatmul.msk.bf16.gmra.mxu2 %vm73_vm0, %v56_v50 }
  0x3c   :  { %409 = vmatmul.msk.bf16.gmra.mxu3 %vm73_vm0, %v186_v51 }
  0x86   :  { %v107_v54 = vpop.f32.mrf.mxu0 }
  0x87   :  { %v236_v55 = vpop.f32.mrf.mxu1  ;;  %v108_v56 = vadd.f32 %v610_v52, %v107_v54 }
  0x88   :  { %v237_v57 = vadd.f32 %v615_v53, %v236_v55 }
  0x89   :  { %v147_v58 = vmax.f32 %v108_v56, 0.0 }
  0x8a   :  { %v276_v59 = vmax.f32 %v237_v57, 0.0 }
  0x8c   :  { %v292_v60 = vmul.f32 %v276_v59, %v147_v58 }
  0x8e   :  { %308 = vxpose.xlu0.b32.start [1/16] %v292_v60, 128  ;;  %v109_v61 = vpop.f32.mrf.mxu0  ;;  %v127_v31 = vpop.f32.mrf.mxu2 }
  0x8f   :  { %v238_v62 = vpop.f32.mrf.mxu1  ;;  %v110_v63 = vadd.f32 %v610_v52, %v109_v61  ;;  %v256_v32 = vpop.f32.mrf.mxu3  ;;  %v128_v48 = vadd.f32 %v610_v52, %v127_v31 }
  0x90   :  { %v239_v0 = vadd.f32 %v615_v53, %v238_v62  ;;  %v257_v50 = vadd.f32 %v615_v53, %v256_v32 }
  0x91   :  { %v148_v1 = vmax.f32 %v110_v63, 0.0  ;;  %v155_v54 = vmax.f32 %v128_v48, 0.0 }
  0x92   :  { %v277_v2 = vmax.f32 %v239_v0, 0.0  ;;  %v284_v55 = vmax.f32 %v257_v50, 0.0 }
  0x94   :  { %v293_v3 = vmul.f32 %v277_v2, %v148_v1  ;;  %v300_v58 = vmul.f32 %v284_v55, %v155_v54 }
  0x96   :  { %309 = vxpose.xlu0.b32.cont [2/16] %v293_v3, 128  ;;  %v112_v4 = vpop.f32.mrf.mxu0  ;;  %v129_v41 = vpop.f32.mrf.mxu2 }
  0x97   :  { %v241_v5 = vpop.f32.mrf.mxu1  ;;  %v113_v6 = vadd.f32 %v610_v52, %v112_v4  ;;  %v258_v42 = vpop.f32.mrf.mxu3  ;;  %v130_v59 = vadd.f32 %v610_v52, %v129_v41 }
  0x98   :  { %v242_v7 = vadd.f32 %v615_v53, %v241_v5  ;;  %v259_v60 = vadd.f32 %v615_v53, %v258_v42 }
  0x99   :  { %v149_v8 = vmax.f32 %v113_v6, 0.0  ;;  %v156_v61 = vmax.f32 %v130_v59, 0.0 }
  0x9a   :  { %v278_v9 = vmax.f32 %v242_v7, 0.0  ;;  %v285_v62 = vmax.f32 %v259_v60, 0.0 }
  0x9c   :  { %v294_v10 = vmul.f32 %v278_v9, %v149_v8  ;;  %v301_v3 = vmul.f32 %v285_v62, %v156_v61 }
  0x9e   :  { %310 = vxpose.xlu0.b32.cont [3/16] %v294_v10, 128  ;;  %v114_v11 = vpop.f32.mrf.mxu0  ;;  %v132_v56 = vpop.f32.mrf.mxu2 }
  0x9f   :  { %v243_v12 = vpop.f32.mrf.mxu1  ;;  %v115_v13 = vadd.f32 %v610_v52, %v114_v11  ;;  %v261_v57 = vpop.f32.mrf.mxu3  ;;  %v133_v1 = vadd.f32 %v610_v52, %v132_v56 }
  0xa0   :  { %v244_v14 = vadd.f32 %v615_v53, %v243_v12  ;;  %v262_v2 = vadd.f32 %v615_v53, %v261_v57 }
  0xa1   :  { %v150_v15 = vmax.f32 %v115_v13, 0.0  ;;  %v157_v4 = vmax.f32 %v133_v1, 0.0 }
  0xa2   :  { %v279_v16 = vmax.f32 %v244_v14, 0.0  ;;  %v286_v5 = vmax.f32 %v262_v2, 0.0 }
  0xa4   :  { %v295_v17 = vmul.f32 %v279_v16, %v150_v15  ;;  %v302_v6 = vmul.f32 %v286_v5, %v157_v4 }
  0xa6   :  { %311 = vxpose.xlu0.b32.cont [4/16] %v295_v17, 128  ;;  %v117_v18 = vpop.f32.mrf.mxu0  ;;  %v134_v63 = vpop.f32.mrf.mxu2 }
  0xa7   :  { %v246_v19 = vpop.f32.mrf.mxu1  ;;  %v118_v20 = vadd.f32 %v610_v52, %v117_v18  ;;  %v263_v0 = vpop.f32.mrf.mxu3  ;;  %v135_v9 = vadd.f32 %v610_v52, %v134_v63 }
  0xa8   :  { %v247_v21 = vadd.f32 %v615_v53, %v246_v19  ;;  %v264_v10 = vadd.f32 %v615_v53, %v263_v0 }
  0xa9   :  { %v151_v22 = vmax.f32 %v118_v20, 0.0  ;;  %v158_v11 = vmax.f32 %v135_v9, 0.0 }
  0xaa   :  { %v280_v23 = vmax.f32 %v247_v21, 0.0  ;;  %v287_v12 = vmax.f32 %v264_v10, 0.0 }
  0xac   :  { %v296_v24 = vmul.f32 %v280_v23, %v151_v22  ;;  %v303_v15 = vmul.f32 %v287_v12, %v158_v11 }
  0xae   :  { %312 = vxpose.xlu0.b32.cont [5/16] %v296_v24, 128  ;;  %v119_v25 = vpop.f32.mrf.mxu0  ;;  %v137_v7 = vpop.f32.mrf.mxu2 }
  0xaf   :  { %v248_v26 = vpop.f32.mrf.mxu1  ;;  %v120_v27 = vadd.f32 %v610_v52, %v119_v25  ;;  %v266_v8 = vpop.f32.mrf.mxu3  ;;  %v138_v13 = vadd.f32 %v610_v52, %v137_v7 }
  0xb0   :  { %v249_v28 = vadd.f32 %v615_v53, %v248_v26  ;;  %v267_v14 = vadd.f32 %v615_v53, %v266_v8 }
  0xb1   :  { %v152_v29 = vmax.f32 %v120_v27, 0.0  ;;  %v159_v18 = vmax.f32 %v138_v13, 0.0 }
  0xb2   :  { %v281_v30 = vmax.f32 %v249_v28, 0.0  ;;  %v288_v19 = vmax.f32 %v267_v14, 0.0 }
  0xb4   :  { %v297_v33 = vmul.f32 %v281_v30, %v152_v29  ;;  %v304_v20 = vmul.f32 %v288_v19, %v159_v18 }
  0xb6   :  { %313 = vxpose.xlu0.b32.cont [6/16] %v297_v33, 128  ;;  %v122_v34 = vpop.f32.mrf.mxu0  ;;  %v139_v16 = vpop.f32.mrf.mxu2 }
  0xb7   :  { %v251_v35 = vpop.f32.mrf.mxu1  ;;  %v123_v36 = vadd.f32 %v610_v52, %v122_v34  ;;  %v268_v17 = vpop.f32.mrf.mxu3  ;;  %v140_v21 = vadd.f32 %v610_v52, %v139_v16 }
  0xb8   :  { %v252_v37 = vadd.f32 %v615_v53, %v251_v35  ;;  %v269_v22 = vadd.f32 %v615_v53, %v268_v17 }
  0xb9   :  { %v153_v38 = vmax.f32 %v123_v36, 0.0  ;;  %v160_v25 = vmax.f32 %v140_v21, 0.0 }
  0xba   :  { %v282_v39 = vmax.f32 %v252_v37, 0.0  ;;  %v289_v26 = vmax.f32 %v269_v22, 0.0 }
  0xbc   :  { %v298_v40 = vmul.f32 %v282_v39, %v153_v38  ;;  %v305_v29 = vmul.f32 %v289_v26, %v160_v25 }
  0xbe   :  { %314 = vxpose.xlu0.b32.cont [7/16] %v298_v40, 128  ;;  %v124_v43 = vpop.f32.mrf.mxu0  ;;  %v142_v23 = vpop.f32.mrf.mxu2 }
  0xbf   :  { %v253_v44 = vpop.f32.mrf.mxu1  ;;  %v125_v45 = vadd.f32 %v610_v52, %v124_v43  ;;  %v271_v24 = vpop.f32.mrf.mxu3  ;;  %v143_v27 = vadd.f32 %v610_v52, %v142_v23 }
  0xc0   :  { %v254_v46 = vadd.f32 %v615_v53, %v253_v44  ;;  %v272_v28 = vadd.f32 %v615_v53, %v271_v24 }
  0xc1   :  { %v154_v47 = vmax.f32 %v125_v45, 0.0  ;;  %v161_v30 = vmax.f32 %v143_v27, 0.0 }
  0xc2   :  { %v283_v49 = vmax.f32 %v254_v46, 0.0  ;;  %v290_v31 = vmax.f32 %v272_v28, 0.0 }
  0xc4   :  { %v299_v51 = vmul.f32 %v283_v49, %v154_v47  ;;  %v306_v34 = vmul.f32 %v290_v31, %v161_v30 }
  0xc6   :  { %315 = vxpose.xlu0.b32.cont [8/16] %v299_v51, 128  ;;  %v144_v32 = vpop.f32.mrf.mxu2 }
  0xc7   :  { %v273_v33 = vpop.f32.mrf.mxu3  ;;  %v145_v35 = vadd.f32 %v610_v52, %v144_v32 }
  0xc8   :  { %v274_v36 = vadd.f32 %v615_v53, %v273_v33 }
  0xc9   :  { %v162_v37 = vmax.f32 %v145_v35, 0.0 }
  0xca   :  { %v291_v38 = vmax.f32 %v274_v36, 0.0 }
  0xcc   :  { %v307_v39 = vmul.f32 %v291_v38, %v162_v37 }
  0xce   :  { %316 = vxpose.xlu0.b32.cont [9/16] %v300_v58, 128 }
  0xd6   :  { %317 = vxpose.xlu0.b32.cont [10/16] %v301_v3, 128 }
  0xde   :  { %318 = vxpose.xlu0.b32.cont [11/16] %v302_v6, 128 }
  0xe6   :  { %319 = vxpose.xlu0.b32.cont [12/16] %v303_v15, 128 }
  0xee   :  { %320 = vxpose.xlu0.b32.cont [13/16] %v304_v20, 128 }
  0xf6   :  { %321 = vxpose.xlu0.b32.cont [14/16] %v305_v29, 128 }
  0xfe   :  { %322 = vxpose.xlu0.b32.cont [15/16] %v306_v34, 128 }
 0x106   :  { %323 = vxpose.xlu0.b32.end [16/16] %v307_v39, 128 }
 0x132   :  { %v324_v40 = vpop.trf.xlu0 }
 0x13a   :  { %v325_v41 = vpop.trf.xlu0 }
 0x13b   :  { %v340_v42 = vadd.f32 %v325_v41, %v324_v40 }
 0x142   :  { %v326_v43 = vpop.trf.xlu0 }
 0x143   :  { %v341_v44 = vadd.f32 %v340_v42, %v326_v43 }
 0x14a   :  { %v327_v45 = vpop.trf.xlu0 }
 0x14b   :  { %v342_v46 = vadd.f32 %v341_v44, %v327_v45 }
 0x152   :  { %v328_v47 = vpop.trf.xlu0 }
 0x153   :  { %v343_v48 = vadd.f32 %v342_v46, %v328_v47 }
 0x15a   :  { %v329_v49 = vpop.trf.xlu0 }
 0x15b   :  { %v344_v57 = vadd.f32 %v343_v48, %v329_v49 }
 0x162   :  { %v330_v50 = vpop.trf.xlu0 }
 0x163   :  { %v345_v58 = vadd.f32 %v344_v57, %v330_v50 }
 0x16a   :  { %v331_v51 = vpop.trf.xlu0 }
 0x16b   :  { %v346_v60 = vadd.f32 %v345_v58, %v331_v51 }
 0x172   :  { %v332_v52 = vpop.trf.xlu0 }
 0x173   :  { %v347_v61 = vadd.f32 %v346_v60, %v332_v52 }
 0x17a   :  { %v333_v54 = vpop.trf.xlu0 }
 0x17b   :  { %v348_v62 = vadd.f32 %v347_v61, %v333_v54 }
 0x182   :  { %v334_v53 = vpop.trf.xlu0 }
 0x183   :  { %v349_v63 = vadd.f32 %v348_v62, %v334_v53 }
 0x18a   :  { %v335_v55 = vpop.trf.xlu0 }
 0x18b   :  { %v350_v1 = vadd.f32 %v349_v63, %v335_v55 }
 0x192   :  { %v336_v56 = vpop.trf.xlu0 }
 0x193   :  { %v351_v2 = vadd.f32 %v350_v1, %v336_v56 }
 0x19a   :  { %v337_v59 = vpop.trf.xlu0 }
 0x19b   :  { %v352_v3 = vadd.f32 %v351_v2, %v337_v59 }
 0x1a2   :  { %v338_v0 = vpop.trf.xlu0 }
 0x1a3   :  { %v353_v4 = vadd.f32 %v352_v3, %v338_v0 }
 0x1aa   :  { %v339_v5 = vpop.trf.xlu0 }
 0x1ab   :  { %v354_v6 = vadd.f32 %v353_v4, %v339_v5 }
 0x1ad   :  { %v355_v7 = vrot.slane %v354_v6, 4 }
 0x1af   :  { %v356_v8 = vadd.f32 %v355_v7, %v354_v6 }
 0x1b1   :  { %v357_v9 = vrot.slane %v356_v8, 2 }
 0x1b3   :  { %v358_v10 = vadd.f32 %v357_v9, %v356_v8 }
 0x1b5   :  { %v359_v11 = vrot.slane %v358_v10, 1 }
 0x1b7   :  { %v360_v12 = vadd.f32 %v359_v11, %v358_v10 }
 0x1b9   :  { %361 = vst [vmem:[#allocation2] sm:$0x1] %v360_v12 }
 0x1ba   :  { %372 = dma.vmem_to_hbm [thread:$0]  %s368_s3, 16, %s370_s19, [#allocation3]  }
 0x1bb   :  { %445 = dma.done.wait [#allocation3], 16  }
 0x1bc   :  { %446 = vsyncadd [#allocation3], 4294967280 }
 0x1bd   :  { %377 = vsyncpa [#allocation3], 1 }

</bundles_post_ra>
